<compile_context>
chip_gen: v5e
topology: v5e:2x2
jax: 0.10.0
libtpu: 0.0.40
codegen_flags: <defaults>
</compile_context>

<pallas_src>
import functools

import jax
import jax.numpy as jnp
from jax.experimental import pallas as pl
from jax.experimental.pallas import tpu as pltpu


def _round_up(x, m):
    return ((x + m - 1) // m) * m


# ----------------------------- fused forward kernel ------------------------------------

def _fused_kernel(x_ref, m1_ref, m2_ref, p1_ref, p2_ref, wf_ref, b_ref,
                  o_ref, s1_ref, s2_ref, s3_ref):
    # x_ref : (nb*16, 64)   f32   samples stacked along rows; cols = w*Cin + ci
    # m1_ref: (192, 128)    bf16  conv1 [row-above | row | row-below] matrices (taps+hpad folded)
    # m2_ref: (192, 128)    bf16  conv2 equivalent
    # p1_ref: (128, 128)    bf16  pool1 column selectors [even | odd]
    # p2_ref: (128, 128)    bf16  pool2 column selectors [even | odd]
    # wf_ref: (256, 128)    bf16  fc weight, NCHW flatten order folded, out-dim padded to 128
    # b_ref : (1, 128)      f32   fc bias (padded)
    # o_ref : (nb, 128)     f32
    # s1/s2/s3 : f32 VMEM scratch enabling sublane-strided pooling / fc reads
    f32, bf16 = jnp.float32, jnp.bfloat16
    nb = x_ref.shape[0] // 16

    def conv3x3_relu(x, m_ref, local_h):
        # Vertical 3x3 taps via sublane rolls; zero the rows that would cross a sample
        # boundary (this is the conv's vertical zero padding).
        rows = jax.lax.broadcasted_iota(jnp.int32, x.shape, 0) % local_h
        up = jnp.where(rows != 0, pltpu.roll(x, 1, 0), 0.0)                 # row above
        dn = jnp.where(rows != local_h - 1,
                       pltpu.roll(x, x.shape[0] - 1, 0), 0.0)               # row below
        lhs = jnp.concatenate([up, x, dn], axis=1).astype(bf16)             # (M, 192)
        y = jnp.dot(lhs, m_ref[...], preferred_element_type=f32)            # (M, 128)
        return jnp.maximum(y, 0.0)

    def maxpool2x2(s_ref, y, p_ref):
        # Row pooling: strided sublane reads + elementwise max (XLU/VPU, no MXU pass).
        s_ref[...] = y
        half = y.shape[0] // 2
        yr = jnp.maximum(s_ref[pl.ds(0, half, 2), :],
                         s_ref[pl.ds(1, half, 2), :])                       # (M/2, 128)
        # Column pooling: one 0/1 selection matmul producing [even | odd] halves.
        z = jnp.dot(yr.astype(bf16), p_ref[...], preferred_element_type=f32)
        return jnp.maximum(z[:, :64], z[:, 64:128])                         # (M/2, 64)

    # ---- ConvBlock(4->8) + MaxPool2d(2,2) ----
    y1 = conv3x3_relu(x_ref[...], m1_ref, 16)          # (nb*16, 128)
    x2 = maxpool2x2(s1_ref, y1, p1_ref)                # (nb*8, 64)

    # ---- ConvBlock(8->16) + MaxPool2d(2,2) ----
    y2 = conv3x3_relu(x2, m2_ref, 8)                   # (nb*8, 128)
    x3 = maxpool2x2(s2_ref, y2, p2_ref)                # (nb*4, 64)

    # ---- fc: Linear(256 -> 32), batched over the whole block ----
    s3_ref[...] = x3
    feats = jnp.concatenate(
        [s3_ref[pl.ds(h, nb, 4), :] for h in range(4)], axis=1).astype(bf16)  # (nb, 256)
    o_ref[...] = b_ref[...] + jnp.dot(feats, wf_ref[...],
                                      preferred_element_type=f32)


# ----------------------------- constant / weight preparation ---------------------------

def _prepare_constants(params):
    """Fold conv taps, horizontal padding, pooling selection and flatten order into
    constant matrices (constant-folded when params are closed over under jit)."""
    w1 = params["w1"].astype(jnp.float32)     # (8, 4, 3, 3)   OIHW
    w2 = params["w2"].astype(jnp.float32)     # (16, 8, 3, 3)
    wf = params["wf"].astype(jnp.float32)     # (32, 256)      (out, in), NCHW flatten order
    bf = params["bf"].astype(jnp.float32)     # (32,)

    def conv_row_mats(w_oihw, width):
        # M[kh][q*Cin + ci, w*Cout + o] = sum_kw [q == w + kw - 1] * w_oihw[o, ci, kh, kw]
        cin, cout = w_oihw.shape[1], w_oihw.shape[0]
        mats = []
        for kh in range(3):
            m = jnp.zeros((width * cin, width * cout), jnp.float32)
            for kw in range(3):
                shift = jnp.eye(width, k=1 - kw, dtype=jnp.float32)
                m = m + jnp.kron(shift, w_oihw[:, :, kh, kw].T)
            mats.append(m)
        return jnp.stack(mats)                               # (3, width*Cin, width*Cout)

    def pool_col_selectors(width, c):
        eye_w = jnp.eye(width, dtype=jnp.float32)
        eye_c = jnp.eye(c, dtype=jnp.float32)
        even = jnp.kron(eye_w[:, 0::2], eye_c)               # (width*c, width*c//2)
        odd = jnp.kron(eye_w[:, 1::2], eye_c)
        return jnp.concatenate([even, odd], axis=1)          # (width*c, width*c) = [even|odd]

    m1 = conv_row_mats(w1, 16).reshape(192, 128)             # [above | center | below]
    m2 = conv_row_mats(w2, 8).reshape(192, 128)
    p1 = pool_col_selectors(16, 8)                           # (128, 128)
    p2 = pool_col_selectors(8, 16)                           # (128, 128)

    # Kernel features per sample row h are (w*C2 + c); PyTorch .view(N,-1) order is
    # c*16 + h*4 + w.  Fold that + h-major lane concat into wf; pad out dim to 128 lanes.
    wf_k = wf.reshape(32, 16, 4, 4).transpose(2, 3, 1, 0).reshape(256, 32)
    wf_k = jnp.pad(wf_k, ((0, 0), (0, 96)))                  # (256, 128)
    b_k = jnp.pad(bf.reshape(1, 32), ((0, 0), (0, 96)))      # (1, 128)

    bf16 = jnp.bfloat16
    return (m1.astype(bf16), m2.astype(bf16), p1.astype(bf16), p2.astype(bf16),
            wf_k.astype(bf16), b_k)


# ----------------------------- ConvNetBottom forward -----------------------------------

def init_params(key):
    k1, k2, k3, k4 = jax.random.split(key, 4)
    # PyTorch conv weights are OIHW; fc weight is (out, in).
    return {
        "w1": jax.random.normal(k1, (8, 4, 3, 3), jnp.float32) * 0.1,
        "w2": jax.random.normal(k2, (16, 8, 3, 3), jnp.float32) * 0.1,
        "wf": jax.random.normal(k3, (32, 256), jnp.float32) * 0.05,
        "bf": jax.random.normal(k4, (32,), jnp.float32) * 0.05,
    }


def convnet_bottom_forward(params, x_nchw, *, samples_per_block=16):
    n, cin, h, w = x_nchw.shape
    assert (cin, h, w) == (4, 16, 16), (cin, h, w)
    m1, m2, p1, p2, wf_k, b_k = _prepare_constants(params)

    # NCHW -> (N*H, W*Cin) stacked lane-dense layout.
    x = jnp.transpose(x_nchw, (0, 2, 3, 1)).reshape(n, h, w * cin).astype(jnp.float32)

    # Samples per grid block: multiple of 8, capped so per-block working set stays small
    # and fixed on every generation (v7x's 64 MiB VMEM included); blocks are "parallel".
    nb = max(8, min(_round_up(samples_per_block, 8), _round_up(n, 8)))
    nblk = -(-n // nb)
    n_pad = nblk * nb
    if n_pad != n:
        x = jnp.pad(x, ((0, n_pad - n), (0, 0), (0, 0)))
    x = x.reshape(n_pad * h, w * cin)

    out = pl.pallas_call(
        _fused_kernel,
        out_shape=jax.ShapeDtypeStruct((n_pad, 128), jnp.float32),
        grid=(nblk,),
        in_specs=[
            pl.BlockSpec((nb * h, w * cin), lambda b: (b, 0)),
            pl.BlockSpec(m1.shape, lambda b: (0, 0)),
            pl.BlockSpec(m2.shape, lambda b: (0, 0)),
            pl.BlockSpec(p1.shape, lambda b: (0, 0)),
            pl.BlockSpec(p2.shape, lambda b: (0, 0)),
            pl.BlockSpec(wf_k.shape, lambda b: (0, 0)),
            pl.BlockSpec(b_k.shape, lambda b: (0, 0)),
        ],
        out_specs=pl.BlockSpec((nb, 128), lambda b: (b, 0)),
        scratch_shapes=[
            pltpu.VMEM((nb * 16, 128), jnp.float32),   # conv1 output (for strided pool reads)
            pltpu.VMEM((nb * 8, 128), jnp.float32),    # conv2 output
            pltpu.VMEM((nb * 4, 64), jnp.float32),     # pooled2 features (for fc reads)
        ],
        compiler_params=pltpu.CompilerParams(dimension_semantics=("parallel",)),
    )(x, m1, m2, p1, p2, wf_k, b_k)
    return out[:n, :32]


# ----------------------------- pure-JAX reference --------------------------------------

def reference_forward(params, x_nchw):
    x = jnp.transpose(x_nchw, (0, 2, 3, 1))

    def conv(x, w_oihw):
        w = jnp.transpose(w_oihw, (2, 3, 1, 0))
        y = jax.lax.conv_general_dilated(
            x, w, (1, 1), ((1, 1), (1, 1)),
            dimension_numbers=("NHWC", "HWIO", "NHWC"),
            precision=jax.lax.Precision.HIGHEST)
        return jnp.maximum(y, 0.0)

    def pool(x):
        n, hh, ww, c = x.shape
        return jnp.max(x.reshape(n, hh // 2, 2, ww // 2, 2, c), axis=(2, 4))

    x = pool(conv(x, params["w1"]))
    x = pool(conv(x, params["w2"]))
    x = jnp.transpose(x, (0, 3, 1, 2)).reshape(x.shape[0], -1)
    return jnp.dot(x, params["wf"].T, precision=jax.lax.Precision.HIGHEST) + params["bf"]


if __name__ == "__main__":
    key = jax.random.PRNGKey(0)
    kx, kp = jax.random.split(key)
    x = jax.random.normal(kx, (2, 4, 16, 16), jnp.float32)   # NCHW, like PyTorch
    params = init_params(kp)

    fwd = jax.jit(functools.partial(convnet_bottom_forward, params))
    out = jax.block_until_ready(fwd(x))

    ref = reference_forward(params, x)
    assert out.shape == (2, 32), out.shape
    # bf16 matmul operands (f32 accumulation) => compare with a bf16-appropriate tolerance.
    if not jnp.allclose(out, ref, atol=5e-2, rtol=5e-2):
        err = float(jnp.max(jnp.abs(out - ref)))
        raise AssertionError(
            f"Pallas output mismatch vs pure-JAX reference (max abs err {err:.3e})")
    print("KERNEL_OK")
</pallas_src>

<mosaic_0001>
module attributes {stable_mosaic.version = 11 : i64} {
  func.func @_fused_kernel(%arg0: i32, %arg1: memref<128x64xf32, #tpu.memory_space<vmem>>, %arg2: memref<192x128xbf16, #tpu.memory_space<vmem>>, %arg3: memref<192x128xbf16, #tpu.memory_space<vmem>>, %arg4: memref<128x128xbf16, #tpu.memory_space<vmem>>, %arg5: memref<128x128xbf16, #tpu.memory_space<vmem>>, %arg6: memref<256x128xbf16, #tpu.memory_space<vmem>>, %arg7: memref<1x128xf32, #tpu.memory_space<vmem>>, %arg8: memref<8x128xf32, #tpu.memory_space<vmem>>, %arg9: memref<128x128xf32, #tpu.memory_space<vmem>>, %arg10: memref<64x128xf32, #tpu.memory_space<vmem>>, %arg11: memref<32x64xf32, #tpu.memory_space<vmem>>) attributes {dimension_semantics = [#tpu.dimension_semantics<parallel>], iteration_bounds = array<i64: 1>, scalar_prefetch = 0 : i64, scratch_operands = 3 : i64, tpu.core_type = #tpu.core_type<tc>, window_params = [{transform_indices = @transform_0, window_bounds = array<i64: 128, 64>}, {pipeline_mode = #tpu.pipeline_mode<synchronous>, transform_indices = @transform_1, window_bounds = array<i64: 192, 128>}, {pipeline_mode = #tpu.pipeline_mode<synchronous>, transform_indices = @transform_2, window_bounds = array<i64: 192, 128>}, {pipeline_mode = #tpu.pipeline_mode<synchronous>, transform_indices = @transform_3, window_bounds = array<i64: 128, 128>}, {pipeline_mode = #tpu.pipeline_mode<synchronous>, transform_indices = @transform_4, window_bounds = array<i64: 128, 128>}, {pipeline_mode = #tpu.pipeline_mode<synchronous>, transform_indices = @transform_5, window_bounds = array<i64: 256, 128>}, {pipeline_mode = #tpu.pipeline_mode<synchronous>, transform_indices = @transform_6, window_bounds = array<i64: 1, 128>}, {transform_indices = @transform_7, window_bounds = array<i64: 8, 128>}]} {
    %c0 = arith.constant 0 : index
    %c0_0 = arith.constant 0 : index
    %0 = vector.load %arg1[%c0, %c0_0] : memref<128x64xf32, #tpu.memory_space<vmem>>, vector<128x64xf32>
    %1 = tpu.iota {dimensions = array<i32: 0>} : vector<128x64xi32>
    %c16_i32 = arith.constant 16 : i32
    %c0_i32 = arith.constant 0 : i32
    %2 = arith.cmpi eq, %c16_i32, %c0_i32 : i32
    %c1_i32 = arith.constant 1 : i32
    %3 = arith.select %2, %c1_i32, %c16_i32 : i32
    %4 = vector.broadcast %3 : i32 to vector<128x64xi32>
    %5 = arith.remsi %1, %4 : vector<128x64xi32>
    %c0_i32_1 = arith.constant 0 : i32
    %6 = vector.broadcast %c0_i32_1 : i32 to vector<128x64xi32>
    %7 = arith.cmpi ne, %5, %6 : vector<128x64xi32>
    %c0_i32_2 = arith.constant 0 : i32
    %8 = vector.broadcast %c0_i32_2 : i32 to vector<128x64xi32>
    %9 = arith.cmpi slt, %5, %8 : vector<128x64xi32>
    %c0_i32_3 = arith.constant 0 : i32
    %10 = arith.cmpi slt, %3, %c0_i32_3 : i32
    %11 = vector.broadcast %10 : i1 to vector<128x64xi1>
    %12 = vector.broadcast %11 : vector<128x64xi1> to vector<128x64xi1>
    %13 = arith.xori %9, %12 : vector<128x64xi1>
    %14 = arith.andi %13, %7 : vector<128x64xi1>
    %15 = vector.broadcast %3 : i32 to vector<128x64xi32>
    %16 = arith.addi %5, %15 : vector<128x64xi32>
    %17 = arith.select %14, %16, %5 : vector<128x64xi1>, vector<128x64xi32>
    %c0_i32_4 = arith.constant 0 : i32
    %18 = vector.broadcast %c0_i32_4 : i32 to vector<128x64xi32>
    %19 = arith.cmpi ne, %17, %18 : vector<128x64xi32>
    %c1_i32_5 = arith.constant 1 : i32
    %20 = tpu.dynamic_rotate %0 by %c1_i32_5 dim 0 : vector<128x64xf32>, i32 -> vector<128x64xf32>
    %cst = arith.constant 0.000000e+00 : f32
    %21 = vector.broadcast %cst : f32 to vector<128x64xf32>
    %22 = arith.select %19, %20, %21 : vector<128x64xi1>, vector<128x64xf32>
    %c15_i32 = arith.constant 15 : i32
    %23 = vector.broadcast %c15_i32 : i32 to vector<128x64xi32>
    %24 = arith.cmpi ne, %17, %23 : vector<128x64xi32>
    %c127_i32 = arith.constant 127 : i32
    %25 = tpu.dynamic_rotate %0 by %c127_i32 dim 0 : vector<128x64xf32>, i32 -> vector<128x64xf32>
    %cst_6 = arith.constant 0.000000e+00 : f32
    %26 = vector.broadcast %cst_6 : f32 to vector<128x64xf32>
    %27 = arith.select %24, %25, %26 : vector<128x64xi1>, vector<128x64xf32>
    %28 = tpu.concatenate %22, %0, %27 in 1 : vector<128x64xf32>, vector<128x64xf32>, vector<128x64xf32> -> vector<128x192xf32>
    %29 = arith.truncf %28 : vector<128x192xf32> to vector<128x192xbf16>
    %c0_7 = arith.constant 0 : index
    %c0_8 = arith.constant 0 : index
    %30 = vector.load %arg2[%c0_7, %c0_8] : memref<192x128xbf16, #tpu.memory_space<vmem>>, vector<192x128xbf16>
    %cst_9 = arith.constant dense<0.000000e+00> : vector<128x128xf32>
    %31 = tpu.matmul %29, %30, %cst_9 {dimension_numbers = #tpu.dot_dimension_numbers<[1], [0], [0], [1], [0, 0, 1, 1], [], []>} : vector<128x192xbf16>, vector<192x128xbf16>, vector<128x128xf32> -> vector<128x128xf32>
    %cst_10 = arith.constant 0.000000e+00 : f32
    %32 = vector.broadcast %cst_10 : f32 to vector<128x128xf32>
    %33 = arith.maximumf %31, %32 : vector<128x128xf32>
    %c0_11 = arith.constant 0 : index
    %c0_12 = arith.constant 0 : index
    %34 = vector.load %arg9[%c0_11, %c0_12] : memref<128x128xf32, #tpu.memory_space<vmem>>, vector<128x128xf32>
    tpu.vector_store %arg9[%c0_11, %c0_12], %33 {strides = array<i32>} : memref<128x128xf32, #tpu.memory_space<vmem>>, vector<128x128xf32>,
    %c0_13 = arith.constant 0 : index
    %c0_14 = arith.constant 0 : index
    %35 = tpu.strided_load %arg9[%c0_13, %c0_14] {strides = array<i32: 2, 1>} : memref<128x128xf32, #tpu.memory_space<vmem>>, vector<64x128xf32>
    %c1 = arith.constant 1 : index
    %c0_15 = arith.constant 0 : index
    %36 = tpu.strided_load %arg9[%c1, %c0_15] {strides = array<i32: 2, 1>} : memref<128x128xf32, #tpu.memory_space<vmem>>, vector<64x128xf32>
    %37 = arith.maximumf %35, %36 : vector<64x128xf32>
    %38 = arith.truncf %37 : vector<64x128xf32> to vector<64x128xbf16>
    %c0_16 = arith.constant 0 : index
    %c0_17 = arith.constant 0 : index
    %39 = vector.load %arg4[%c0_16, %c0_17] : memref<128x128xbf16, #tpu.memory_space<vmem>>, vector<128x128xbf16>
    %cst_18 = arith.constant dense<0.000000e+00> : vector<64x128xf32>
    %40 = tpu.matmul %38, %39, %cst_18 {dimension_numbers = #tpu.dot_dimension_numbers<[1], [0], [0], [1], [0, 0, 1, 1], [], []>} : vector<64x128xbf16>, vector<128x128xbf16>, vector<64x128xf32> -> vector<64x128xf32>
    %41 = vector.extract_strided_slice %40 {offsets = [0, 0], sizes = [64, 64], strides = [1, 1]} : vector<64x128xf32> to vector<64x64xf32>
    %42 = vector.extract_strided_slice %40 {offsets = [0, 64], sizes = [64, 64], strides = [1, 1]} : vector<64x128xf32> to vector<64x64xf32>
    %43 = arith.maximumf %41, %42 : vector<64x64xf32>
    %44 = tpu.iota {dimensions = array<i32: 0>} : vector<64x64xi32>
    %c8_i32 = arith.constant 8 : i32
    %c0_i32_19 = arith.constant 0 : i32
    %45 = arith.cmpi eq, %c8_i32, %c0_i32_19 : i32
    %c1_i32_20 = arith.constant 1 : i32
    %46 = arith.select %45, %c1_i32_20, %c8_i32 : i32
    %47 = vector.broadcast %46 : i32 to vector<64x64xi32>
    %48 = arith.remsi %44, %47 : vector<64x64xi32>
    %c0_i32_21 = arith.constant 0 : i32
    %49 = vector.broadcast %c0_i32_21 : i32 to vector<64x64xi32>
    %50 = arith.cmpi ne, %48, %49 : vector<64x64xi32>
    %c0_i32_22 = arith.constant 0 : i32
    %51 = vector.broadcast %c0_i32_22 : i32 to vector<64x64xi32>
    %52 = arith.cmpi slt, %48, %51 : vector<64x64xi32>
    %c0_i32_23 = arith.constant 0 : i32
    %53 = arith.cmpi slt, %46, %c0_i32_23 : i32
    %54 = vector.broadcast %53 : i1 to vector<64x64xi1>
    %55 = vector.broadcast %54 : vector<64x64xi1> to vector<64x64xi1>
    %56 = arith.xori %52, %55 : vector<64x64xi1>
    %57 = arith.andi %56, %50 : vector<64x64xi1>
    %58 = vector.broadcast %46 : i32 to vector<64x64xi32>
    %59 = arith.addi %48, %58 : vector<64x64xi32>
    %60 = arith.select %57, %59, %48 : vector<64x64xi1>, vector<64x64xi32>
    %c0_i32_24 = arith.constant 0 : i32
    %61 = vector.broadcast %c0_i32_24 : i32 to vector<64x64xi32>
    %62 = arith.cmpi ne, %60, %61 : vector<64x64xi32>
    %c1_i32_25 = arith.constant 1 : i32
    %63 = tpu.dynamic_rotate %43 by %c1_i32_25 dim 0 : vector<64x64xf32>, i32 -> vector<64x64xf32>
    %cst_26 = arith.constant 0.000000e+00 : f32
    %64 = vector.broadcast %cst_26 : f32 to vector<64x64xf32>
    %65 = arith.select %62, %63, %64 : vector<64x64xi1>, vector<64x64xf32>
    %c7_i32 = arith.constant 7 : i32
    %66 = vector.broadcast %c7_i32 : i32 to vector<64x64xi32>
    %67 = arith.cmpi ne, %60, %66 : vector<64x64xi32>
    %c63_i32 = arith.constant 63 : i32
    %68 = tpu.dynamic_rotate %43 by %c63_i32 dim 0 : vector<64x64xf32>, i32 -> vector<64x64xf32>
    %cst_27 = arith.constant 0.000000e+00 : f32
    %69 = vector.broadcast %cst_27 : f32 to vector<64x64xf32>
    %70 = arith.select %67, %68, %69 : vector<64x64xi1>, vector<64x64xf32>
    %71 = tpu.concatenate %65, %43, %70 in 1 : vector<64x64xf32>, vector<64x64xf32>, vector<64x64xf32> -> vector<64x192xf32>
    %72 = arith.truncf %71 : vector<64x192xf32> to vector<64x192xbf16>
    %c0_28 = arith.constant 0 : index
    %c0_29 = arith.constant 0 : index
    %73 = vector.load %arg3[%c0_28, %c0_29] : memref<192x128xbf16, #tpu.memory_space<vmem>>, vector<192x128xbf16>
    %cst_30 = arith.constant dense<0.000000e+00> : vector<64x128xf32>
    %74 = tpu.matmul %72, %73, %cst_30 {dimension_numbers = #tpu.dot_dimension_numbers<[1], [0], [0], [1], [0, 0, 1, 1], [], []>} : vector<64x192xbf16>, vector<192x128xbf16>, vector<64x128xf32> -> vector<64x128xf32>
    %cst_31 = arith.constant 0.000000e+00 : f32
    %75 = vector.broadcast %cst_31 : f32 to vector<64x128xf32>
    %76 = arith.maximumf %74, %75 : vector<64x128xf32>
    %c0_32 = arith.constant 0 : index
    %c0_33 = arith.constant 0 : index
    %77 = vector.load %arg10[%c0_32, %c0_33] : memref<64x128xf32, #tpu.memory_space<vmem>>, vector<64x128xf32>
    tpu.vector_store %arg10[%c0_32, %c0_33], %76 {strides = array<i32>} : memref<64x128xf32, #tpu.memory_space<vmem>>, vector<64x128xf32>,
    %c0_34 = arith.constant 0 : index
    %c0_35 = arith.constant 0 : index
    %78 = tpu.strided_load %arg10[%c0_34, %c0_35] {strides = array<i32: 2, 1>} : memref<64x128xf32, #tpu.memory_space<vmem>>, vector<32x128xf32>
    %c1_36 = arith.constant 1 : index
    %c0_37 = arith.constant 0 : index
    %79 = tpu.strided_load %arg10[%c1_36, %c0_37] {strides = array<i32: 2, 1>} : memref<64x128xf32, #tpu.memory_space<vmem>>, vector<32x128xf32>
    %80 = arith.maximumf %78, %79 : vector<32x128xf32>
    %81 = arith.truncf %80 : vector<32x128xf32> to vector<32x128xbf16>
    %c0_38 = arith.constant 0 : index
    %c0_39 = arith.constant 0 : index
    %82 = vector.load %arg5[%c0_38, %c0_39] : memref<128x128xbf16, #tpu.memory_space<vmem>>, vector<128x128xbf16>
    %cst_40 = arith.constant dense<0.000000e+00> : vector<32x128xf32>
    %83 = tpu.matmul %81, %82, %cst_40 {dimension_numbers = #tpu.dot_dimension_numbers<[1], [0], [0], [1], [0, 0, 1, 1], [], []>} : vector<32x128xbf16>, vector<128x128xbf16>, vector<32x128xf32> -> vector<32x128xf32>
    %84 = vector.extract_strided_slice %83 {offsets = [0, 0], sizes = [32, 64], strides = [1, 1]} : vector<32x128xf32> to vector<32x64xf32>
    %85 = vector.extract_strided_slice %83 {offsets = [0, 64], sizes = [32, 64], strides = [1, 1]} : vector<32x128xf32> to vector<32x64xf32>
    %86 = arith.maximumf %84, %85 : vector<32x64xf32>
    %c0_41 = arith.constant 0 : index
    %c0_42 = arith.constant 0 : index
    %87 = vector.load %arg11[%c0_41, %c0_42] : memref<32x64xf32, #tpu.memory_space<vmem>>, vector<32x64xf32>
    tpu.vector_store %arg11[%c0_41, %c0_42], %86 {strides = array<i32>} : memref<32x64xf32, #tpu.memory_space<vmem>>, vector<32x64xf32>,
    %c0_43 = arith.constant 0 : index
    %c0_44 = arith.constant 0 : index
    %88 = tpu.strided_load %arg11[%c0_43, %c0_44] {strides = array<i32: 4, 1>} : memref<32x64xf32, #tpu.memory_space<vmem>>, vector<8x64xf32>
    %c1_45 = arith.constant 1 : index
    %c0_46 = arith.constant 0 : index
    %89 = tpu.strided_load %arg11[%c1_45, %c0_46] {strides = array<i32: 4, 1>} : memref<32x64xf32, #tpu.memory_space<vmem>>, vector<8x64xf32>
    %c2 = arith.constant 2 : index
    %c0_47 = arith.constant 0 : index
    %90 = tpu.strided_load %arg11[%c2, %c0_47] {strides = array<i32: 4, 1>} : memref<32x64xf32, #tpu.memory_space<vmem>>, vector<8x64xf32>
    %c3 = arith.constant 3 : index
    %c0_48 = arith.constant 0 : index
    %91 = tpu.strided_load %arg11[%c3, %c0_48] {strides = array<i32: 4, 1>} : memref<32x64xf32, #tpu.memory_space<vmem>>, vector<8x64xf32>
    %92 = tpu.concatenate %88, %89, %90, %91 in 1 : vector<8x64xf32>, vector<8x64xf32>, vector<8x64xf32>, vector<8x64xf32> -> vector<8x256xf32>
    %93 = arith.truncf %92 : vector<8x256xf32> to vector<8x256xbf16>
    %c0_49 = arith.constant 0 : index
    %c0_50 = arith.constant 0 : index
    %94 = vector.load %arg7[%c0_49, %c0_50] : memref<1x128xf32, #tpu.memory_space<vmem>>, vector<1x128xf32>
    %c0_51 = arith.constant 0 : index
    %c0_52 = arith.constant 0 : index
    %95 = vector.load %arg6[%c0_51, %c0_52] : memref<256x128xbf16, #tpu.memory_space<vmem>>, vector<256x128xbf16>
    %cst_53 = arith.constant dense<0.000000e+00> : vector<8x128xf32>
    %96 = tpu.matmul %93, %95, %cst_53 {dimension_numbers = #tpu.dot_dimension_numbers<[1], [0], [0], [1], [0, 0, 1, 1], [], []>} : vector<8x256xbf16>, vector<256x128xbf16>, vector<8x128xf32> -> vector<8x128xf32>
    %97 = vector.broadcast %94 : vector<1x128xf32> to vector<8x128xf32>
    %98 = arith.addf %97, %96 : vector<8x128xf32>
    %c0_54 = arith.constant 0 : index
    %c0_55 = arith.constant 0 : index
    %99 = vector.load %arg8[%c0_54, %c0_55] : memref<8x128xf32, #tpu.memory_space<vmem>>, vector<8x128xf32>
    tpu.vector_store %arg8[%c0_54, %c0_55], %98 {strides = array<i32>} : memref<8x128xf32, #tpu.memory_space<vmem>>, vector<8x128xf32>,
    return
  }
  func.func @transform_0(%arg0: i32) -> (i32, i32) {
    %c0_i32 = arith.constant 0 : i32
    %c0_i32_0 = arith.constant 0 : i32
    return %arg0, %c0_i32 : i32, i32
  }
  func.func @transform_1(%arg0: i32) -> (i32, i32) {
    %c0_i32 = arith.constant 0 : i32
    %c0_i32_0 = arith.constant 0 : i32
    %c0_i32_1 = arith.constant 0 : i32
    return %c0_i32, %c0_i32_0 : i32, i32
  }
  func.func @transform_2(%arg0: i32) -> (i32, i32) {
    %c0_i32 = arith.constant 0 : i32
    %c0_i32_0 = arith.constant 0 : i32
    %c0_i32_1 = arith.constant 0 : i32
    return %c0_i32, %c0_i32_0 : i32, i32
  }
  func.func @transform_3(%arg0: i32) -> (i32, i32) {
    %c0_i32 = arith.constant 0 : i32
    %c0_i32_0 = arith.constant 0 : i32
    %c0_i32_1 = arith.constant 0 : i32
    return %c0_i32, %c0_i32_0 : i32, i32
  }
  func.func @transform_4(%arg0: i32) -> (i32, i32) {
    %c0_i32 = arith.constant 0 : i32
    %c0_i32_0 = arith.constant 0 : i32
    %c0_i32_1 = arith.constant 0 : i32
    return %c0_i32, %c0_i32_0 : i32, i32
  }
  func.func @transform_5(%arg0: i32) -> (i32, i32) {
    %c0_i32 = arith.constant 0 : i32
    %c0_i32_0 = arith.constant 0 : i32
    %c0_i32_1 = arith.constant 0 : i32
    return %c0_i32, %c0_i32_0 : i32, i32
  }
  func.func @transform_6(%arg0: i32) -> (i32, i32) {
    %c0_i32 = arith.constant 0 : i32
    %c0_i32_0 = arith.constant 0 : i32
    %c0_i32_1 = arith.constant 0 : i32
    return %c0_i32, %c0_i32_0 : i32, i32
  }
  func.func @transform_7(%arg0: i32) -> (i32, i32) {
    %c0_i32 = arith.constant 0 : i32
    %c0_i32_0 = arith.constant 0 : i32
    return %arg0, %c0_i32 : i32, i32
  }
}

</mosaic_0001>

<bundles_post_ra>
// kernel: convnet_bottom_forward.1
= control target key start
LH: loop header
LB: loop body
LE: loop exit
PB: predicated region body
PF: predicated region fallthrough
CT: control target
= control target key end

     0   :  { %s1975_s9 = smov 64   ;;  %v43_v18 = vlaneseq  ;;  %vm446_vm2 = vcmask 523264   ;;  %s2672_s0 = inlined_call_operand.vmem [shape: f32[128,64], index: 0, kind: input, shape index: {}]   ;;  %s2673_s1 = inlined_call_operand.vmem [shape: bf16[192,128], index: 1, kind: input, shape index: {}]   ;;  %s2674_s3 = inlined_call_operand.vmem [shape: bf16[128,128], index: 3, kind: input, shape index: {}]   ;;  %s2675_s2 = inlined_call_operand.vmem [shape: bf16[192,128], index: 2, kind: input, shape index: {}]   ;;  %s2676_s4 = inlined_call_operand.vmem [shape: bf16[128,128], index: 4, kind: input, shape index: {}]   ;;  %s2677_s5 = inlined_call_operand.vmem [shape: bf16[256,128], index: 5, kind: input, shape index: {}]   ;;  %s2678_s6 = inlined_call_operand.vmem [shape: f32[1,128], index: 6, kind: input, shape index: {}]   ;;  %s2679_s7 = inlined_call_operand.vmem [shape: f32[8,128], index: 7, kind: output, shape index: {}]  }
   0x1   :  { %v2019_v0 = vld [vmem:[%s2672_s0] sm:$0xff]  ;;  %v2024_v1 = vld [vmem:[%s2672_s0 + $0x8] sm:$0xff]  ;;  %v1849_v7 = vld [vmem:[%s2673_s1 + $0x38] sm:$0xff] }
   0x2   :  { %v1899_v2 = vpack.i.bf16 %v2024_v1, %v2019_v0  ;;  %v2031_v3 = vld [vmem:[%s2672_s0 + $0x20] sm:$0xff]  ;;  %v2036_v4 = vld [vmem:[%s2672_s0 + $0x28] sm:$0xff]  ;;  %v2055_v8 = vld [vmem:[%s2672_s0 + $0x10] sm:$0xff]  ;;  %599 = vmatpush.bf16.msra.mxu0 %v1849_v7  ;;  %v334_v23 = vrot.slane %v2024_v1, 1  ;;  %v2110_v26 = vshrl.u32 %v43_v18, 7  ;;  %v333_v27 = vrot.slane %v2019_v0, 1 }
   0x3   :  { %v2042_v5 = vld [vmem:[%s2672_s0 + $0x40] sm:$0xff]  ;;  %v2047_v6 = vld [vmem:[%s2672_s0 + $0x48] sm:$0xff]  ;;  %v2060_v9 = vld [vmem:[%s2672_s0 + $0x18] sm:$0xff]  ;;  %v1909_v10 = vpack.i.bf16 %v2036_v4, %v2031_v3  ;;  %v335_v24 = vrot.slane %v2055_v8, 1  ;;  %v269_v46 = vrot.slane %v2024_v1, 7  ;;  %v268_v47 = vrot.slane %v2019_v0, 7 }
   0x4   :  { %1900 = vrot.lane.b32.xlu0 %v1899_v2, %s1975_s9  ;;  %v1848_v11 = vld [vmem:[%s2673_s1 + $0x30] sm:$0xff]  ;;  %v1853_v12 = vld [vmem:[%s2673_s1 + $0x58] sm:$0xff]  ;;  %v1919_v13 = vpack.i.bf16 %v2047_v6, %v2042_v5  ;;  %v1904_v14 = vpack.i.bf16 %v2060_v9, %v2055_v8  ;;  %v1847_v19 = vld [vmem:[%s2673_s1 + $0x28] sm:$0xff]  ;;  %v2129_v32 = vadd.s32 8, %v2110_v26  ;;  %vm349_vm0 = vcmp.lt.s32.totalorder %v2110_v26, 7 }
   0x5   :  { %1910 = vrot.lane.b32.xlu1 %v1909_v10, %s1975_s9  ;;  %v2078_v15 = vld [vmem:[%s2672_s0 + $0x30] sm:$0xff]  ;;  %v2083_v16 = vld [vmem:[%s2672_s0 + $0x38] sm:$0xff]  ;;  %652 = vmatpush.bf16.msra.mxu1 %v1853_v12  ;;  %v1851_v25 = vld [vmem:[%s2673_s1 + $0x48] sm:$0xff]  ;;  %v363_v38 = vsel %vm349_vm0, %v334_v23, %v335_v24  ;;  %v364_v39 = vsel %vm349_vm0, %v333_v27, %v334_v23  ;;  %vm284_vm3 = vcmp.lt.s32.totalorder %v2110_v26, 1  ;;  %v336_v50 = vrot.slane %v2060_v9, 1 }
   0x6   :  { %v1852_v17 = vld [vmem:[%s2673_s1 + $0x50] sm:$0xff]  ;;  %1920 = vrot.lane.b32.xlu2 %v1919_v13, %s1975_s9  ;;  %600 = vmatpush.bf16.msra.mxu0 %v1848_v11  ;;  %v2100_v21 = vld [vmem:[%s2672_s0 + $0x58] sm:$0xff]  ;;  %v1914_v22 = vpack.i.bf16 %v2083_v16, %v2078_v15  ;;  %v2116_v28 = vld [vmem:[%s2672_s0 + $0x60] sm:$0xff]  ;;  %v71_v37 = vand.u32 15, %v2129_v32  ;;  %v299_v49 = vsel %vm284_vm3, %v268_v47, %v269_v46  ;;  %v337_v51 = vrot.slane %v2031_v3, 1 }
   0x7   :  { %v2095_v20 = vld [vmem:[%s2672_s0 + $0x50] sm:$0xff]  ;;  %v2121_v29 = vld [vmem:[%s2672_s0 + $0x68] sm:$0xff]  ;;  %v1846_v31 = vld [vmem:[%s2673_s1 + $0x20] sm:$0xff]  ;;  %v271_v52 = vrot.slane %v2060_v9, 7  ;;  %v270_v53 = vrot.slane %v2055_v8, 7  ;;  %v2183_v54 = vadd.s32 24, %v2110_v26  ;;  %v362_v57 = vsel %vm349_vm0, %v335_v24, %v336_v50 }
   0x8   :  { %v1924_v30 = vpack.i.bf16 %v2100_v21, %v2095_v20  ;;  %v1929_v33 = vpack.i.bf16 %v2121_v29, %v2116_v28  ;;  %v1850_v34 = vld [vmem:[%s2673_s1 + $0x40] sm:$0xff]  ;;  %v2141_v35 = vld [vmem:[%s2672_s0 + $0x70] sm:$0xff]  ;;  %v2146_v36 = vld [vmem:[%s2672_s0 + $0x78] sm:$0xff]  ;;  %vm318_vm1 = vcmp.ne.s32.totalorder %v71_v37, 15  ;;  %v361_v55 = vsel %vm349_vm0, %v336_v50, %v337_v51 }
   0x9   :  { %653 = vmatpush.bf16.msra.mxu1 %v1852_v17  ;;  %v1845_v40 = vld [vmem:[%s2673_s1 + $0x18] sm:$0xff]  ;;  %v1934_v41 = vpack.i.bf16 %v2146_v36, %v2141_v35  ;;  %v367_v42 = vsel %vm318_vm1, %v363_v38, 0.0  ;;  %v1844_v44 = vld [vmem:[%s2673_s1 + $0x10] sm:$0xff]  ;;  %v1843_v45 = vld [vmem:[%s2673_s1 + $0x8] sm:$0xff]  ;;  %v85_v56 = vand.u32 15, %v2183_v54  ;;  %v2192_v58 = vsel %vm284_vm3, %v270_v53, %v271_v52 }
   0xa   :  { %601 = vmatpush.bf16.msra.mxu0 %v1847_v19  ;;  %v464_v43 = vpack.c.bf16 %v367_v42, %v364_v39  ;;  %v1842_v48 = vld [vmem:[%s2673_s1] sm:$0xff]  ;;  %v2196_v59 = vsel %vm284_vm3, %v269_v46, %v270_v53  ;;  %v338_v62 = vrot.slane %v2036_v4, 1  ;;  %v339_v63 = vrot.slane %v2078_v15, 1  ;;  %v1861_v0 = vld [vmem:[%s2674_s3 + $0x38] sm:$0xff] }
   0xb   :  { %vm320_vm4 = vcmp.ne.s32.totalorder %v85_v56, 15  ;;  %v273_v1 = vrot.slane %v2036_v4, 7  ;;  %v272_v2 = vrot.slane %v2031_v3, 7  ;;  %v2204_v7 = vadd.s32 40, %v2110_v26  ;;  %836 = vmatpush.bf16.msra.mxu2 %v1861_v0 }
   0xc   :  { %1905 = vrot.lane.b32.xlu0 %v1904_v14, %s1975_s9  ;;  %v369_v60 = vsel %vm320_vm4, %v361_v55, 0.0  ;;  %v359_v8 = vsel %vm349_vm0, %v338_v62, %v339_v63  ;;  %v360_v9 = vsel %vm349_vm0, %v337_v51, %v338_v62  ;;  %v2216_v4 = vadd.s32 32, %v2110_v26 }
   0xd   :  { %1915 = vrot.lane.b32.xlu1 %v1914_v22, %s1975_s9  ;;  %654 = vmatpush.bf16.msra.mxu1 %v1851_v25  ;;  %v466_v61 = vpack.c.bf16 %v369_v60, %v362_v57  ;;  %v295_v10 = vsel %vm284_vm3, %v272_v2, %v273_v1  ;;  %v296_v11 = vsel %vm284_vm3, %v271_v52, %v272_v2  ;;  %v99_v12 = vand.u32 15, %v2204_v7 }
   0xe   :  { %1925 = vrot.lane.b32.xlu2 %v1924_v30, %s1975_s9  ;;  %602 = vmatpush.bf16.msra.mxu0 %v1846_v31  ;;  %v283_v3 = vrot.slane %v2146_v36, 7  ;;  %v64_v13 = vand.u32 15, %v2110_v26  ;;  %v92_v18 = vand.u32 15, %v2216_v4  ;;  %v2226_v22 = vadd.s32 16, %v2110_v26 }
   0xf   :  { %vm322_vm5 = vcmp.ne.s32.totalorder %v99_v12, 15  ;;  %v340_v37 = vrot.slane %v2083_v16, 1  ;;  %v341_v38 = vrot.slane %v2042_v5, 1  ;;  %v274_v39 = vrot.slane %v2078_v15, 7 }
  0x10   :  { %v371_v14 = vsel %vm322_vm5, %v359_v8, 0.0  ;;  %vm252_vm6 = vcmp.ne.s32.totalorder %v64_v13, 0  ;;  %v300_v19 = vsel %vm284_vm3, %v283_v3, %v268_v47  ;;  %vm2229_vm7 = vcmp.ne.s32.totalorder %v92_v18, 0 }
  0x11   :  { %655 = vmatpush.bf16.msra.mxu1 %v1850_v34  ;;  %v468_v17 = vpack.c.bf16 %v371_v14, %v360_v9  ;;  %v301_v24 = vsel %vm252_vm6, %v300_v19, 0.0  ;;  %v275_v34 = vrot.slane %v2083_v16, 7  ;;  %v358_v51 = vsel %vm349_vm0, %v339_v63, %v340_v37 }
  0x12   :  { %603 = vmatpush.bf16.msra.mxu0 %v1845_v40  ;;  %v2256_v52 = vadd.s32 48, %v2110_v26  ;;  %v294_v60 = vsel %vm284_vm3, %v273_v1, %v274_v39  ;;  %v342_v19 = vrot.slane %v2047_v6, 1  ;;  %v53_v25 = vadd.s32 72, %v2110_v26 }
  0x13   :  { %v293_v53 = vsel %vm284_vm3, %v274_v39, %v275_v34 }
  0x14   :  { %1930 = vrot.lane.b32.xlu0 %v1929_v33, %s1975_s9  ;;  %1654 = vmatmul.msk.bf16.vlgmr.msra.gmra.mxu1 %vm446_vm2, %v464_v43  ;;  %v78_v33 = vand.u32 15, %v2226_v22  ;;  %v305_v43 = vsel %vm2229_vm7, %v296_v11, 0.0  ;;  %v106_v63 = vand.u32 15, %v2256_v52 }
  0x15   :  { %1935 = vrot.lane.b32.xlu1 %v1934_v41, %s1975_s9 }
  0x16   :  { %604 = vmatpush.bf16.msra.mxu0 %v1844_v44  ;;  %vm2242_vm8 = vcmp.ne.s32.totalorder %v78_v33, 0  ;;  %vm258_vm10 = vcmp.ne.s32.totalorder %v106_v63, 0 }
  0x17   :  { %v303_v56 = vsel %vm2242_vm8, %v2196_v59, 0.0  ;;  %v307_v14 = vsel %vm258_vm10, %v294_v60, 0.0 }
  0x1a   :  { %605 = vmatpush.bf16.msra.mxu0 %v1843_v45 }
  0x1e   :  { %606 = vmatpush.bf16.msra.mxu0 %v1842_v48  ;;  %v2249_v48 = vadd.s32 56, %v2110_v26 }
  0x20   :  { %v113_v57 = vand.u32 15, %v2249_v48 }
  0x22   :  { %vm324_vm9 = vcmp.ne.s32.totalorder %v113_v57, 15  ;;  %v54_v57 = vadd.s32 80, %v2110_v26 }
  0x24   :  { %1655 = vmatmul.msk.bf16.gmra.mxu1 %vm446_vm2, %v466_v61 }
  0x34   :  { %1656 = vmatmul.msk.bf16.gmra.mxu1 %vm446_vm2, %v468_v17 }
  0x60   :  { %v1921_v33 = vpop.permute.xlu2 %1920 }
  0x61   :  { %v1923_v39 = vunpack.i.h.bf16 %v1921_v33 }
  0x76   :  { %v1901_v23 = vpop.permute.xlu0 %1900 }
  0x77   :  { %v1903_v30 = vunpack.i.h.bf16 %v1901_v23  ;;  %v1902_v31 = vunpack.i.l.bf16 %v1901_v23  ;;  %v1911_v42 = vpop.permute.xlu1 %1910  ;;  %v343_v23 = vrot.slane %v2095_v20, 1 }
  0x78   :  { %v1913_v45 = vunpack.i.h.bf16 %v1911_v42  ;;  %v1912_v46 = vunpack.i.l.bf16 %v1911_v42 }
  0x79   :  { %v447_v40 = vsel %vm446_vm2, %v301_v24, %v1902_v31  ;;  %v448_v41 = vsel %vm446_vm2, %v299_v49, %v1903_v30  ;;  %v357_v49 = vsel %vm349_vm0, %v340_v37, %v341_v38  ;;  %v276_v24 = vrot.slane %v2042_v5, 7 }
  0x7a   :  { %v463_v44 = vpack.c.bf16 %v448_v41, %v447_v40  ;;  %v451_v16 = vsel %vm446_vm2, %v305_v43, %v1912_v46  ;;  %v452_v15 = vsel %vm446_vm2, %v295_v10, %v1913_v45  ;;  %v373_v9 = vsel %vm324_vm9, %v357_v49, 0.0 }
  0x7b   :  { %v467_v50 = vpack.c.bf16 %v452_v15, %v451_v16  ;;  %v470_v59 = vpack.c.bf16 %v373_v9, %v358_v51  ;;  %v355_v30 = vsel %vm349_vm0, %v342_v19, %v343_v23  ;;  %v356_v31 = vsel %vm349_vm0, %v341_v38, %v342_v19 }
  0x7c   :  { %607 = vmatmul.bf16.vlgmr.msra.gmra.mxu0 %v463_v44  ;;  %v52_v37 = vadd.s32 64, %v2110_v26  ;;  %v127_v5 = vand.u32 15, %v53_v25  ;;  %v1922_v41 = vunpack.i.l.bf16 %v1921_v33  ;;  %v345_v16 = vrot.slane %v2116_v28, 1 }
  0x7d   :  { %1657 = vmatmul.msk.bf16.gmra.mxu1 %vm446_vm2, %v470_v59  ;;  %v344_v15 = vrot.slane %v2100_v21, 1  ;;  %v278_v49 = vrot.slane %v2095_v20, 7  ;;  %v55_v51 = vadd.s32 88, %v2110_v26  ;;  %v346_v59 = vrot.slane %v2121_v29, 1 }
  0x7e   :  { %v1906_v55 = vpop.permute.xlu0 %1905  ;;  %v120_v42 = vand.u32 15, %v52_v37  ;;  %vm326_vm11 = vcmp.ne.s32.totalorder %v127_v5, 15  ;;  %v348_v5 = vrot.slane %v2146_v36, 1 }
  0x7f   :  { %v1908_v61 = vunpack.i.h.bf16 %v1906_v55  ;;  %v1907_v62 = vunpack.i.l.bf16 %v1906_v55  ;;  %v1916_v10 = vpop.permute.xlu1 %1915  ;;  %v375_v44 = vsel %vm326_vm11, %v355_v30, 0.0  ;;  %v354_v55 = vsel %vm349_vm0, %v343_v23, %v344_v15 }
  0x80   :  { %v1918_v12 = vunpack.i.h.bf16 %v1916_v10  ;;  %v1917_v13 = vunpack.i.l.bf16 %v1916_v10  ;;  %vm260_vm12 = vcmp.ne.s32.totalorder %v120_v42, 0  ;;  %v472_v38 = vpack.c.bf16 %v375_v44, %v356_v31 }
  0x81   :  { %v449_v2 = vsel %vm446_vm2, %v303_v56, %v1907_v62  ;;  %v450_v8 = vsel %vm446_vm2, %v2192_v58, %v1908_v61  ;;  %v277_v58 = vrot.slane %v2047_v6, 7  ;;  %v292_v6 = vsel %vm284_vm3, %v275_v34, %v276_v24  ;;  %v1926_v56 = vpop.permute.xlu2 %1925 }
  0x82   :  { %v465_v11 = vpack.c.bf16 %v450_v8, %v449_v2  ;;  %v453_v1 = vsel %vm446_vm2, %v307_v14, %v1917_v13  ;;  %v454_v17 = vsel %vm446_vm2, %v293_v53, %v1918_v12  ;;  %v309_v45 = vsel %vm260_vm12, %v292_v6, 0.0 }
  0x83   :  { %v469_v18 = vpack.c.bf16 %v454_v17, %v453_v1  ;;  %v291_v40 = vsel %vm284_vm3, %v276_v24, %v277_v58  ;;  %v455_v46 = vsel %vm446_vm2, %v309_v45, %v1922_v41  ;;  %v279_v34 = vrot.slane %v2100_v21, 7 }
  0x84   :  { %v456_v43 = vsel %vm446_vm2, %v291_v40, %v1923_v39  ;;  %v353_v53 = vsel %vm349_vm0, %v344_v15, %v345_v16  ;;  %v1928_v60 = vunpack.i.h.bf16 %v1926_v56  ;;  %v290_v21 = vsel %vm284_vm3, %v277_v58, %v278_v49 }
  0x85   :  { %v471_v47 = vpack.c.bf16 %v456_v43, %v455_v46  ;;  %v289_v61 = vsel %vm284_vm3, %v278_v49, %v279_v34  ;;  %v141_v20 = vand.u32 15, %v55_v51  ;;  %v134_v62 = vand.u32 15, %v54_v57  ;;  %v1860_v57 = vld [vmem:[%s2674_s3 + $0x30] sm:$0xff] }
  0x86   :  { %v458_v63 = vsel %vm446_vm2, %v289_v61, %v1928_v60  ;;  %v347_v12 = vrot.slane %v2141_v35, 1  ;;  %v281_v13 = vrot.slane %v2121_v29, 7  ;;  %v280_v14 = vrot.slane %v2116_v28, 7  ;;  %v1931_v23 = vpop.permute.xlu0 %1930  ;;  %837 = vmatpush.bf16.msra.mxu2 %v1860_v57  ;;  %v1859_v60 = vld [vmem:[%s2674_s3 + $0x28] sm:$0xff]  ;;  %v1858_v61 = vld [vmem:[%s2674_s3 + $0x20] sm:$0xff] }
  0x87   :  { %vm328_vm13 = vcmp.ne.s32.totalorder %v141_v20, 15  ;;  %vm262_vm14 = vcmp.ne.s32.totalorder %v134_v62, 0  ;;  %v57_v1 = vadd.s32 104, %v2110_v26  ;;  %v352_v19 = vsel %vm349_vm0, %v345_v16, %v346_v59  ;;  %v1936_v44 = vpop.permute.xlu1 %1935  ;;  %v1857_v20 = vld [vmem:[%s2674_s3 + $0x18] sm:$0xff] }
  0x88   :  { %v377_v2 = vsel %vm328_vm13, %v353_v53, 0.0  ;;  %v311_v8 = vsel %vm262_vm14, %v290_v21, 0.0  ;;  %v351_v17 = vsel %vm349_vm0, %v346_v59, %v347_v12  ;;  %v56_v58 = vadd.s32 96, %v2110_v26 }
  0x89   :  { %v474_v9 = vpack.c.bf16 %v377_v2, %v354_v55  ;;  %v1933_v24 = vunpack.i.h.bf16 %v1931_v23  ;;  %v287_v25 = vsel %vm284_vm3, %v280_v14, %v281_v13  ;;  %v288_v29 = vsel %vm284_vm3, %v279_v34, %v280_v14  ;;  %v1855_v2 = vld [vmem:[%s2674_s3 + $0x8] sm:$0xff] }
  0x8a   :  { %v155_v28 = vand.u32 15, %v57_v1  ;;  %v148_v30 = vand.u32 15, %v56_v58  ;;  %v282_v41 = vrot.slane %v2141_v35, 7  ;;  %v59_v42 = vadd.s32 120, %v2110_v26  ;;  %838 = vmatpush.bf16.msra.mxu2 %v1859_v60 }
  0x8b   :  { %v460_v31 = vsel %vm446_vm2, %v287_v25, %v1933_v24  ;;  %v350_v43 = vsel %vm349_vm0, %v347_v12, %v348_v5  ;;  %v58_v45 = vadd.s32 112, %v2110_v26  ;;  %v365_v35 = vsel %vm349_vm0, %v348_v5, %v333_v27 }
  0x8c   :  { %612 = vmatmul.bf16.gmra.mxu0 %v465_v11  ;;  %vm330_vm15 = vcmp.ne.s32.totalorder %v155_v28, 15  ;;  %vm264_vm1 = vcmp.ne.s32.totalorder %v148_v30, 0  ;;  %v285_v46 = vsel %vm284_vm3, %v282_v41, %v283_v3  ;;  %v286_v16 = vsel %vm284_vm3, %v281_v13, %v282_v41 }
  0x8d   :  { %1658 = vmatmul.msk.bf16.gmra.mxu1 %vm446_vm2, %v472_v38  ;;  %v379_v33 = vsel %vm330_vm15, %v351_v17, 0.0  ;;  %v313_v37 = vsel %vm264_vm1, %v288_v29, 0.0  ;;  %v1938_v38 = vunpack.i.h.bf16 %v1936_v44  ;;  %v169_v15 = vand.u32 15, %v59_v42 }
  0x8e   :  { %v476_v39 = vpack.c.bf16 %v379_v33, %v352_v19  ;;  %v162_v34 = vand.u32 15, %v58_v45  ;;  %839 = vmatpush.bf16.msra.mxu2 %v1858_v61 }
  0x8f   :  { %vm332_vm4 = vcmp.ne.s32.totalorder %v169_v15, 15  ;;  %v462_v49 = vsel %vm446_vm2, %v285_v46, %v1938_v38 }
  0x90   :  { %vm266_vm5 = vcmp.ne.s32.totalorder %v162_v34, 0  ;;  %v381_v51 = vsel %vm332_vm4, %v365_v35, 0.0 }
  0x91   :  { %v315_v36 = vsel %vm266_vm5, %v286_v16, 0.0  ;;  %v478_v53 = vpack.c.bf16 %v381_v51, %v350_v43 }
  0x92   :  { %840 = vmatpush.bf16.msra.mxu2 %v1857_v20 }
  0x9c   :  { %617 = vmatmul.bf16.gmra.mxu0 %v467_v50  ;;  %v1927_v50 = vunpack.i.l.bf16 %v1926_v56  ;;  %v657_v56 = vpop.f32.mrf.mxu1 }
  0x9d   :  { %1659 = vmatmul.msk.bf16.gmra.mxu1 %vm446_vm2, %v474_v9 }
  0x9e   :  { %v457_v10 = vsel %vm446_vm2, %v311_v8, %v1927_v50  ;;  %v1856_v50 = vld [vmem:[%s2674_s3 + $0x10] sm:$0xff] }
  0x9f   :  { %v473_v11 = vpack.c.bf16 %v458_v63, %v457_v10  ;;  %841 = vmatpush.bf16.msra.mxu2 %v1856_v50  ;;  %v1854_v10 = vld [vmem:[%s2674_s3] sm:$0xff] }
  0xa3   :  { %842 = vmatpush.bf16.msra.mxu2 %v1855_v2 }
  0xa4   :  { %v659_v27 = vpop.f32.mrf.mxu1 }
  0xa7   :  { %843 = vmatpush.bf16.msra.mxu2 %v1854_v10 }
  0xac   :  { %622 = vmatmul.bf16.gmra.mxu0 %v469_v18  ;;  %v1932_v18 = vunpack.i.l.bf16 %v1931_v23  ;;  %v662_v21 = vpop.f32.mrf.mxu1 }
  0xad   :  { %1660 = vmatmul.msk.bf16.gmra.mxu1 %vm446_vm2, %v476_v39 }
  0xae   :  { %v459_v40 = vsel %vm446_vm2, %v313_v37, %v1932_v18 }
  0xaf   :  { %v475_v6 = vpack.c.bf16 %v460_v31, %v459_v40 }
  0xb4   :  { %v664_v63 = vpop.f32.mrf.mxu1 }
  0xbc   :  { %627 = vmatmul.bf16.gmra.mxu0 %v471_v47  ;;  %v1937_v47 = vunpack.i.l.bf16 %v1936_v44  ;;  %v667_v12 = vpop.f32.mrf.mxu1 }
  0xbd   :  { %1661 = vmatmul.msk.bf16.gmra.mxu1 %vm446_vm2, %v478_v53 }
  0xbe   :  { %v461_v3 = vsel %vm446_vm2, %v315_v36, %v1937_v47 }
  0xbf   :  { %v477_v55 = vpack.c.bf16 %v462_v49, %v461_v3 }
  0xc4   :  { %v669_v19 = vpop.f32.mrf.mxu1 }
  0xcc   :  { %632 = vmatmul.bf16.gmra.mxu0 %v473_v11 }
  0xdc   :  { %637 = vmatmul.bf16.gmra.mxu0 %v475_v6 }
  0xec   :  { %642 = vmatmul.bf16.gmra.mxu0 %v477_v55 }
  0xf9   :  { %v608_v62 = vpop.f32.mrf.mxu0 }
  0xfa   :  { %v658_v8 = vadd.f32 %v657_v56, %v608_v62  ;;  %v672_v25 = vpop.f32.mrf.mxu1 }
  0xfc   :  { %v697_v9 = vmax.f32 %v658_v8, 0.0 }
  0xfe   :  { %713 = vst [vmem:[#allocation2] sm:$0xff] %v697_v9 }
 0x101   :  { %v610_v11 = vpop.f32.mrf.mxu0 }
 0x102   :  { %v660_v59 = vadd.f32 %v659_v27, %v610_v11  ;;  %v674_v41 = vpop.f32.mrf.mxu1 }
 0x104   :  { %v698_v13 = vmax.f32 %v660_v59, 0.0 }
 0x106   :  { %714 = vst [vmem:[#allocation2 + $0x8] sm:$0xff] %v698_v13 }
 0x109   :  { %v613_v14 = vpop.f32.mrf.mxu0 }
 0x10a   :  { %v663_v1 = vadd.f32 %v662_v21, %v613_v14  ;;  %v677_v38 = vpop.f32.mrf.mxu1 }
 0x10c   :  { %v699_v17 = vmax.f32 %v663_v1, 0.0 }
 0x10d   :  { %v729_v18 = vld [vmem:[#allocation2] ss:$2 sm:$0xff]  ;;  %v745_v30 = vld [vmem:[#allocation2 + $0x1] ss:$2 sm:$0xff] }
 0x10e   :  { %715 = vst [vmem:[#allocation2 + $0x10] sm:$0xff] %v699_v17  ;;  %v760_v39 = vmax.f32 %v729_v18, %v745_v30 }
 0x111   :  { %v615_v23 = vpop.f32.mrf.mxu0 }
 0x112   :  { %v665_v58 = vadd.f32 %v664_v63, %v615_v23  ;;  %v679_v47 = vpop.f32.mrf.mxu1 }
 0x114   :  { %v700_v24 = vmax.f32 %v665_v58, 0.0 }
 0x116   :  { %716 = vst [vmem:[#allocation2 + $0x18] sm:$0xff] %v700_v24 }
 0x119   :  { %v618_v29 = vpop.f32.mrf.mxu0 }
 0x11a   :  { %v668_v28 = vadd.f32 %v667_v12, %v618_v29  ;;  %v682_v27 = vpop.f32.mrf.mxu1 }
 0x11c   :  { %v701_v31 = vmax.f32 %v668_v28, 0.0 }
 0x11d   :  { %v731_v33 = vld [vmem:[#allocation2 + $0x10] ss:$2 sm:$0xff]  ;;  %v747_v37 = vld [vmem:[#allocation2 + $0x11] ss:$2 sm:$0xff] }
 0x11e   :  { %717 = vst [vmem:[#allocation2 + $0x20] sm:$0xff] %v701_v31  ;;  %v761_v40 = vmax.f32 %v731_v33, %v747_v37 }
 0x120   :  { %v768_v6 = vpack.c.bf16 %v761_v40, %v760_v39 }
 0x121   :  { %v620_v5 = vpop.f32.mrf.mxu0 }
 0x122   :  { %v670_v42 = vadd.f32 %v669_v19, %v620_v5  ;;  %844 = vmatmul.bf16.vlgmr.msra.gmra.mxu2 %v768_v6  ;;  %v684_v50 = vpop.f32.mrf.mxu1 }
 0x124   :  { %v702_v43 = vmax.f32 %v670_v42, 0.0 }
 0x126   :  { %718 = vst [vmem:[#allocation2 + $0x28] sm:$0xff] %v702_v43 }
 0x129   :  { %v623_v44 = vpop.f32.mrf.mxu0 }
 0x12a   :  { %v673_v45 = vadd.f32 %v672_v25, %v623_v44  ;;  %v687_v9 = vpop.f32.mrf.mxu1 }
 0x12c   :  { %v703_v46 = vmax.f32 %v673_v45, 0.0 }
 0x12d   :  { %v733_v51 = vld [vmem:[#allocation2 + $0x20] ss:$2 sm:$0xff]  ;;  %v749_v36 = vld [vmem:[#allocation2 + $0x21] ss:$2 sm:$0xff] }
 0x12e   :  { %719 = vst [vmem:[#allocation2 + $0x30] sm:$0xff] %v703_v46  ;;  %v762_v56 = vmax.f32 %v733_v51, %v749_v36 }
 0x131   :  { %v625_v16 = vpop.f32.mrf.mxu0 }
 0x132   :  { %v675_v15 = vadd.f32 %v674_v41, %v625_v16  ;;  %v689_v1 = vpop.f32.mrf.mxu1 }
 0x134   :  { %v704_v35 = vmax.f32 %v675_v15, 0.0 }
 0x136   :  { %720 = vst [vmem:[#allocation2 + $0x38] sm:$0xff] %v704_v35 }
 0x139   :  { %v628_v34 = vpop.f32.mrf.mxu0 }
 0x13a   :  { %v678_v49 = vadd.f32 %v677_v38, %v628_v34  ;;  %v692_v18 = vpop.f32.mrf.mxu1 }
 0x13c   :  { %v705_v53 = vmax.f32 %v678_v49, 0.0 }
 0x13d   :  { %v735_v3 = vld [vmem:[#allocation2 + $0x30] ss:$2 sm:$0xff]  ;;  %v751_v55 = vld [vmem:[#allocation2 + $0x31] ss:$2 sm:$0xff] }
 0x13e   :  { %721 = vst [vmem:[#allocation2 + $0x40] sm:$0xff] %v705_v53  ;;  %v763_v0 = vmax.f32 %v735_v3, %v751_v55  ;;  %v1873_v53 = vld [vmem:[%s2675_s2 + $0x58] sm:$0xff]  ;;  %v1872_v3 = vld [vmem:[%s2675_s2 + $0x50] sm:$0xff] }
 0x13f   :  { %1254 = vmatpush.bf16.msrb.mxu2 %v1873_v53 }
 0x140   :  { %v769_v57 = vpack.c.bf16 %v763_v0, %v762_v56  ;;  %v916_v0 = vand.u32 7, %v2129_v32 }
 0x141   :  { %v630_v60 = vpop.f32.mrf.mxu0 }
 0x142   :  { %v680_v61 = vadd.f32 %v679_v47, %v630_v60  ;;  %849 = vmatmul.bf16.gmra.mxu2 %v769_v57  ;;  %v694_v37 = vpop.f32.mrf.mxu1  ;;  %vm2394_vm6 = vcmp.ne.s32.totalorder %v916_v0, 0  ;;  %vm1034_vm8 = vcmp.ne.s32.totalorder %v916_v0, 7 }
 0x143   :  { %1255 = vmatpush.bf16.msrb.mxu2 %v1872_v3 }
 0x144   :  { %v706_v21 = vmax.f32 %v680_v61, 0.0 }
 0x146   :  { %722 = vst [vmem:[#allocation2 + $0x48] sm:$0xff] %v706_v21 }
 0x149   :  { %v633_v20 = vpop.f32.mrf.mxu0 }
 0x14a   :  { %v683_v62 = vadd.f32 %v682_v27, %v633_v20 }
 0x14c   :  { %v707_v63 = vmax.f32 %v683_v62, 0.0 }
 0x14d   :  { %v737_v12 = vld [vmem:[#allocation2 + $0x40] ss:$2 sm:$0xff]  ;;  %v753_v13 = vld [vmem:[#allocation2 + $0x41] ss:$2 sm:$0xff] }
 0x14e   :  { %723 = vst [vmem:[#allocation2 + $0x50] sm:$0xff] %v707_v63  ;;  %v764_v23 = vmax.f32 %v737_v12, %v753_v13  ;;  %v909_v12 = vand.u32 7, %v2110_v26 }
 0x150   :  { %vm1033_vm7 = vcmp.ne.s32.totalorder %v909_v12, 7  ;;  %vm1001_vm4 = vcmp.ne.s32.totalorder %v909_v12, 0 }
 0x151   :  { %v635_v2 = vpop.f32.mrf.mxu0 }
 0x152   :  { %v685_v8 = vadd.f32 %v684_v50, %v635_v2 }
 0x154   :  { %v708_v10 = vmax.f32 %v685_v8, 0.0  ;;  %v1871_v8 = vld [vmem:[%s2675_s2 + $0x48] sm:$0xff] }
 0x155   :  { %1256 = vmatpush.bf16.msrb.mxu2 %v1871_v8 }
 0x156   :  { %724 = vst [vmem:[#allocation2 + $0x58] sm:$0xff] %v708_v10 }
 0x159   :  { %v638_v11 = vpop.f32.mrf.mxu0 }
 0x15a   :  { %v688_v59 = vadd.f32 %v687_v9, %v638_v11  ;;  %v1870_v9 = vld [vmem:[%s2675_s2 + $0x40] sm:$0xff] }
 0x15b   :  { %1257 = vmatpush.bf16.msrb.mxu2 %v1870_v9 }
 0x15c   :  { %v709_v14 = vmax.f32 %v688_v59, 0.0 }
 0x15d   :  { %v739_v17 = vld [vmem:[#allocation2 + $0x50] ss:$2 sm:$0xff]  ;;  %v755_v19 = vld [vmem:[#allocation2 + $0x51] ss:$2 sm:$0xff] }
 0x15e   :  { %725 = vst [vmem:[#allocation2 + $0x60] sm:$0xff] %v709_v14  ;;  %v765_v58 = vmax.f32 %v739_v17, %v755_v19 }
 0x160   :  { %v770_v24 = vpack.c.bf16 %v765_v58, %v764_v23 }
 0x161   :  { %v640_v25 = vpop.f32.mrf.mxu0 }
 0x162   :  { %v690_v29 = vadd.f32 %v689_v1, %v640_v25  ;;  %854 = vmatmul.bf16.gmra.mxu2 %v770_v24 }
 0x164   :  { %v710_v28 = vmax.f32 %v690_v29, 0.0 }
 0x166   :  { %726 = vst [vmem:[#allocation2 + $0x68] sm:$0xff] %v710_v28  ;;  %v1869_v28 = vld [vmem:[%s2675_s2 + $0x38] sm:$0xff] }
 0x167   :  { %1221 = vmatpush.bf16.msra.mxu3 %v1869_v28 }
 0x169   :  { %v643_v30 = vpop.f32.mrf.mxu0 }
 0x16a   :  { %v693_v31 = vadd.f32 %v692_v18, %v643_v30 }
 0x16c   :  { %v711_v33 = vmax.f32 %v693_v31, 0.0 }
 0x16d   :  { %v741_v5 = vld [vmem:[#allocation2 + $0x60] ss:$2 sm:$0xff]  ;;  %v757_v41 = vld [vmem:[#allocation2 + $0x61] ss:$2 sm:$0xff] }
 0x16e   :  { %727 = vst [vmem:[#allocation2 + $0x70] sm:$0xff] %v711_v33  ;;  %v766_v44 = vmax.f32 %v741_v5, %v757_v41  ;;  %v1865_v5 = vld [vmem:[%s2675_s2 + $0x18] sm:$0xff]  ;;  %v1864_v41 = vld [vmem:[%s2675_s2 + $0x10] sm:$0xff] }
 0x171   :  { %v645_v39 = vpop.f32.mrf.mxu0 }
 0x172   :  { %v695_v40 = vadd.f32 %v694_v37, %v645_v39  ;;  %v1868_v39 = vld [vmem:[%s2675_s2 + $0x30] sm:$0xff] }
 0x173   :  { %1222 = vmatpush.bf16.msra.mxu3 %v1868_v39 }
 0x174   :  { %v712_v6 = vmax.f32 %v695_v40, 0.0  ;;  %v1867_v40 = vld [vmem:[%s2675_s2 + $0x28] sm:$0xff] }
 0x176   :  { %728 = vst [vmem:[#allocation2 + $0x78] sm:$0xff] %v712_v6  ;;  %v1866_v6 = vld [vmem:[%s2675_s2 + $0x20] sm:$0xff] }
 0x177   :  { %1223 = vmatpush.bf16.msra.mxu3 %v1867_v40 }
 0x17b   :  { %1224 = vmatpush.bf16.msra.mxu3 %v1866_v6 }
 0x17d   :  { %v743_v42 = vld [vmem:[#allocation2 + $0x70] ss:$2 sm:$0xff]  ;;  %v759_v43 = vld [vmem:[#allocation2 + $0x71] ss:$2 sm:$0xff] }
 0x17e   :  { %v767_v45 = vmax.f32 %v743_v42, %v759_v43  ;;  %v1863_v42 = vld [vmem:[%s2675_s2 + $0x8] sm:$0xff] }
 0x17f   :  { %1225 = vmatpush.bf16.msra.mxu3 %v1865_v5 }
 0x180   :  { %v771_v38 = vpack.c.bf16 %v767_v45, %v766_v44  ;;  %v923_v45 = vand.u32 7, %v2226_v22 }
 0x182   :  { %859 = vmatmul.bf16.gmra.mxu2 %v771_v38  ;;  %vm2467_vm9 = vcmp.ne.s32.totalorder %v923_v45, 7 }
 0x183   :  { %1226 = vmatpush.bf16.msra.mxu3 %v1864_v41 }
 0x187   :  { %1227 = vmatpush.bf16.msra.mxu3 %v1863_v42 }
 0x1a5   :  { %v845_v46 = vpop.f32.mrf.mxu2 }
 0x1ad   :  { %v847_v16 = vpop.f32.mrf.mxu2 }
 0x1ae   :  { %v1939_v15 = vpack.i.bf16 %v847_v16, %v845_v46 }
 0x1b0   :  { %1940 = vrot.lane.b32.xlu2 %v1939_v15, %s1975_s9  ;;  %v930_v15 = vand.u32 7, %v2183_v54 }
 0x1b2   :  { %vm2473_vm10 = vcmp.ne.s32.totalorder %v930_v15, 7 }
 0x1c5   :  { %v850_v35 = vpop.f32.mrf.mxu2 }
 0x1cd   :  { %v852_v47 = vpop.f32.mrf.mxu2 }
 0x1ce   :  { %v1944_v34 = vpack.i.bf16 %v852_v47, %v850_v35 }
 0x1d0   :  { %1945 = vrot.lane.b32.xlu0 %v1944_v34, %s1975_s9 }
 0x1e5   :  { %v2369_v49 = vpop.f32.mrf.mxu2 }
 0x1ed   :  { %v2371_v51 = vpop.f32.mrf.mxu2 }
 0x1ee   :  { %v1949_v36 = vpack.i.bf16 %v2371_v51, %v2369_v49 }
 0x1f0   :  { %1950 = vrot.lane.b32.xlu1 %v1949_v36, %s1975_s9  ;;  %v1862_v36 = vld [vmem:[%s2675_s2] sm:$0xff] }
 0x1f1   :  { %1228 = vmatpush.bf16.msra.mxu3 %v1862_v36 }
 0x205   :  { %v2382_v55 = vpop.f32.mrf.mxu2 }
 0x206   :  { %885 = vrot.lane.b32.xlu1 %v2382_v55, %s1975_s9 }
 0x20a   :  { %v1941_v56 = vpop.permute.xlu2 %1940 }
 0x20b   :  { %v1943_v27 = vunpack.i.h.bf16 %v1941_v56  ;;  %v1942_v57 = vunpack.i.l.bf16 %v1941_v56  ;;  %v1880_v56 = vld [vmem:[%s2676_s4 + $0x30] sm:$0xff] }
 0x20d   :  { %v898_v60 = vmax.f32 %v847_v16, %v1943_v27  ;;  %v2387_v61 = vmax.f32 %v845_v46, %v1942_v57  ;;  %v2389_v21 = vpop.f32.mrf.mxu2  ;;  %v944_v16 = vand.u32 7, %v2204_v7 }
 0x20e   :  { %887 = vrot.lane.b32.xlu2 %v2389_v21, %s1975_s9 }
 0x20f   :  { %v1010_v20 = vrot.slane %v898_v60, 7  ;;  %v1009_v50 = vrot.slane %v2387_v61, 7  ;;  %v1954_v63 = vpack.i.bf16 %v898_v60, %v2387_v61  ;;  %v1042_v10 = vrot.slane %v898_v60, 1 }
 0x210   :  { %v1041_v11 = vrot.slane %v2387_v61, 1  ;;  %vm2479_vm11 = vcmp.ne.s32.totalorder %v944_v16, 0  ;;  %vm2517_vm14 = vcmp.ne.s32.totalorder %v944_v16, 7 }
 0x211   :  { %v2403_v32 = vsel %vm284_vm3, %v1009_v50, %v1010_v20  ;;  %1955 = vrot.lane.b32.xlu0 %v1954_v63, %s1975_s9 }
 0x212   :  { %v1026_v2 = vsel %vm2394_vm6, %v2403_v32, 0.0  ;;  %v1055_v19 = vsel %vm349_vm0, %v1041_v11, %v1042_v10  ;;  %vm1003_vm6 = vcmp.ne.s32.totalorder %v923_v45, 0 }
 0x213   :  { %v1057_v31 = vsel %vm1033_vm7, %v1055_v19, 0.0  ;;  %vm1004_vm7 = vcmp.ne.s32.totalorder %v930_v15, 0 }
 0x242   :  { %v1946_v59 = vpop.permute.xlu0 %1945 }
 0x243   :  { %v1948_v13 = vunpack.i.h.bf16 %v1946_v59  ;;  %v1947_v14 = vunpack.i.l.bf16 %v1946_v59 }
 0x245   :  { %v900_v1 = vmax.f32 %v852_v47, %v1948_v13  ;;  %v899_v17 = vmax.f32 %v850_v35, %v1947_v14  ;;  %v937_v35 = vand.u32 7, %v2216_v4 }
 0x247   :  { %v1012_v23 = vrot.slane %v900_v1, 7  ;;  %v1011_v58 = vrot.slane %v899_v17, 7  ;;  %v1043_v24 = vrot.slane %v899_v17, 1  ;;  %v1959_v25 = vpack.i.bf16 %v900_v1, %v899_v17 }
 0x248   :  { %v1044_v43 = vrot.slane %v900_v1, 1  ;;  %vm2483_vm12 = vcmp.ne.s32.totalorder %v937_v35, 0  ;;  %v951_v1 = vand.u32 7, %v2256_v52  ;;  %vm2513_vm13 = vcmp.ne.s32.totalorder %v937_v35, 7 }
 0x249   :  { %v1054_v29 = vsel %vm349_vm0, %v1042_v10, %v1043_v24  ;;  %v2430_v18 = vsel %vm284_vm3, %v1011_v58, %v1012_v23  ;;  %v2434_v30 = vsel %vm284_vm3, %v1010_v20, %v1011_v58  ;;  %1960 = vrot.lane.b32.xlu2 %v1959_v25, %s1975_s9  ;;  %v1875_v25 = vld [vmem:[%s2676_s4 + $0x8] sm:$0xff] }
 0x24a   :  { %v1058_v33 = vsel %vm1034_vm8, %v1054_v29, 0.0  ;;  %v1053_v4 = vsel %vm349_vm0, %v1043_v24, %v1044_v43  ;;  %vm2523_vm15 = vcmp.ne.s32.totalorder %v951_v1, 0  ;;  %vm1039_vm5 = vcmp.ne.s32.totalorder %v951_v1, 7  ;;  %v1876_v24 = vld [vmem:[%s2676_s4 + $0x10] sm:$0xff] }
 0x24b   :  { %v1106_v37 = vpack.c.bf16 %v1058_v33, %v1057_v31  ;;  %v1059_v20 = vsel %vm2467_vm9, %v1053_v4, 0.0  ;;  %v1028_v61 = vsel %vm1004_vm7, %v2430_v18, 0.0 }
 0x24d   :  { %1742 = vmatmul.msk.bf16.vlgmr.msrb.gmra.mxu2 %vm446_vm2, %v1106_v37 }
 0x262   :  { %v1951_v44 = vpop.permute.xlu1 %1950 }
 0x263   :  { %v1953_v38 = vunpack.i.h.bf16 %v1951_v44  ;;  %v1952_v46 = vunpack.i.l.bf16 %v1951_v44 }
 0x265   :  { %v902_v47 = vmax.f32 %v2371_v51, %v1953_v38  ;;  %v901_v34 = vmax.f32 %v2369_v49, %v1952_v46 }
 0x267   :  { %v1014_v49 = vrot.slane %v902_v47, 7  ;;  %v1013_v51 = vrot.slane %v901_v34, 7  ;;  %v1045_v3 = vrot.slane %v901_v34, 1  ;;  %v1964_v0 = vpack.i.bf16 %v902_v47, %v901_v34 }
 0x268   :  { %v888_v13 = vpop.permute.xlu2 %887  ;;  %v1046_v14 = vrot.slane %v902_v47, 1 }
 0x269   :  { %v1052_v57 = vsel %vm349_vm0, %v1044_v43, %v1045_v3  ;;  %v2491_v60 = vsel %vm284_vm3, %v1013_v51, %v1014_v49  ;;  %1965 = vrot.lane.b32.xlu0 %v1964_v0, %s1975_s9  ;;  %v2500_v8 = vsel %vm284_vm3, %v1012_v23, %v1013_v51  ;;  %v904_v17 = vmax.f32 %v2389_v21, %v888_v13 }
 0x26a   :  { %v1060_v63 = vsel %vm2473_vm10, %v1052_v57, 0.0  ;;  %v1030_v9 = vsel %vm2479_vm11, %v2491_v60, 0.0  ;;  %v1029_v59 = vsel %vm2483_vm12, %v2500_v8, 0.0  ;;  %v958_v23 = vand.u32 7, %v2249_v48  ;;  %v1881_v8 = vld [vmem:[%s2676_s4 + $0x38] sm:$0xff] }
 0x26b   :  { %v1108_v10 = vpack.c.bf16 %v1060_v63, %v1059_v20  ;;  %v1051_v29 = vsel %vm349_vm0, %v1045_v3, %v1046_v14  ;;  %v1016_v48 = vrot.slane %v904_v17, 7  ;;  %v1048_v35 = vrot.slane %v904_v17, 1  ;;  %1380 = vmatpush.bf16.msrb.mxu3 %v1881_v8  ;;  %v1889_v8 = vld [vmem:[%s2677_s5 + $0x38] sm:$0xff] }
 0x26c   :  { %vm2527_vm1 = vcmp.ne.s32.totalorder %v958_v23, 0  ;;  %v1061_v40 = vsel %vm2513_vm13, %v1051_v29, 0.0  ;;  %v1874_v29 = vld [vmem:[%s2676_s4] sm:$0xff] }
 0x26d   :  { %1743 = vmatmul.msk.bf16.gmra.mxu2 %vm446_vm2, %v1108_v10  ;;  %v1024_v43 = vsel %vm284_vm3, %v1016_v48, %v1009_v50  ;;  %v1056_v50 = vsel %vm349_vm0, %v1048_v35, %v1041_v11  ;;  %v1879_v10 = vld [vmem:[%s2676_s4 + $0x28] sm:$0xff] }
 0x26e   :  { %v1025_v16 = vsel %vm1001_vm4, %v1024_v43, 0.0 }
 0x26f   :  { %1381 = vmatpush.bf16.msrb.mxu3 %v1880_v56  ;;  %v1895_v56 = vld [vmem:[%s2677_s5 + $0x68] sm:$0xff] }
 0x273   :  { %1382 = vmatpush.bf16.msrb.mxu3 %v1879_v10 }
 0x278   :  { %v886_v19 = vpop.permute.xlu1 %885 }
 0x279   :  { %v903_v58 = vmax.f32 %v2382_v55, %v886_v19  ;;  %v1877_v19 = vld [vmem:[%s2676_s4 + $0x18] sm:$0xff] }
 0x27b   :  { %v1015_v55 = vrot.slane %v903_v58, 7  ;;  %v1047_v28 = vrot.slane %v903_v58, 1  ;;  %v1969_v31 = vpack.i.bf16 %v904_v17, %v903_v58 }
 0x27d   :  { %1970 = vrot.lane.b32.xlu1 %v1969_v31, %s1975_s9  ;;  %v1050_v33 = vsel %vm349_vm0, %v1046_v14, %v1047_v28  ;;  %v1017_v37 = vsel %vm284_vm3, %v1015_v55, %v1016_v48  ;;  %v1018_v39 = vsel %vm284_vm3, %v1014_v49, %v1015_v55  ;;  %v1049_v12 = vsel %vm349_vm0, %v1047_v28, %v1048_v35  ;;  %v1878_v14 = vld [vmem:[%s2676_s4 + $0x20] sm:$0xff] }
 0x27e   :  { %v1062_v6 = vsel %vm2517_vm14, %v1050_v33, 0.0  ;;  %v1031_v5 = vsel %vm2523_vm15, %v1018_v39, 0.0  ;;  %v1032_v41 = vsel %vm2527_vm1, %v1017_v37, 0.0  ;;  %vm1040_vm3 = vcmp.ne.s32.totalorder %v958_v23, 7  ;;  %1383 = vmatpush.bf16.msrb.mxu3 %v1878_v14  ;;  %v1893_v14 = vld [vmem:[%s2677_s5 + $0x58] sm:$0xff] }
 0x27f   :  { %v1110_v42 = vpack.c.bf16 %v1062_v6, %v1061_v40  ;;  %v1063_v53 = vsel %vm1039_vm5, %v1049_v12, 0.0  ;;  %v1064_v7 = vsel %vm1040_vm3, %v1056_v50, 0.0  ;;  %v1027_v49 = vsel %vm1003_vm6, %v2434_v30, 0.0 }
 0x280   :  { %v1112_v4 = vpack.c.bf16 %v1064_v7, %v1063_v53 }
 0x281   :  { %1744 = vmatmul.msk.bf16.gmra.mxu2 %vm446_vm2, %v1110_v42 }
 0x282   :  { %1384 = vmatpush.bf16.msrb.mxu3 %v1877_v19  ;;  %v1885_v19 = vld [vmem:[%s2677_s5 + $0x18] sm:$0xff] }
 0x283   :  { %v1956_v44 = vpop.permute.xlu0 %1955 }
 0x284   :  { %v1958_v38 = vunpack.i.h.bf16 %v1956_v44  ;;  %v1957_v46 = vunpack.i.l.bf16 %v1956_v44 }
 0x286   :  { %v1097_v47 = vsel %vm446_vm2, %v1025_v16, %v1957_v46  ;;  %v1098_v34 = vsel %vm446_vm2, %v1026_v2, %v1958_v38  ;;  %1385 = vmatpush.bf16.msrb.mxu3 %v1876_v24 }
 0x287   :  { %v1105_v36 = vpack.c.bf16 %v1098_v34, %v1097_v47 }
 0x289   :  { %1229 = vmatmul.bf16.vlgmr.msra.gmra.mxu3 %v1105_v36 }
 0x28a   :  { %1386 = vmatpush.bf16.msrb.mxu3 %v1875_v25 }
 0x28e   :  { %1387 = vmatpush.bf16.msrb.mxu3 %v1874_v29  ;;  %v1890_v29 = vld [vmem:[%s2677_s5 + $0x40] sm:$0xff] }
 0x291   :  { %1745 = vmatmul.msk.bf16.gmra.mxu2 %vm446_vm2, %v1112_v4 }
 0x292   :  { %1571 = vmatpush.bf16.msra.mxu3 %v1889_v8 }
 0x2a3   :  { %v1961_v62 = vpop.permute.xlu2 %1960 }
 0x2a4   :  { %v1963_v32 = vunpack.i.h.bf16 %v1961_v62  ;;  %v1962_v2 = vunpack.i.l.bf16 %v1961_v62 }
 0x2a6   :  { %v1099_v26 = vsel %vm446_vm2, %v1027_v49, %v1962_v2  ;;  %v1100_v11 = vsel %vm446_vm2, %v1028_v61, %v1963_v32 }
 0x2a7   :  { %v1107_v51 = vpack.c.bf16 %v1100_v11, %v1099_v26 }
 0x2a9   :  { %1234 = vmatmul.bf16.gmra.mxu3 %v1107_v51 }
 0x2d0   :  { %v1259_v60 = vpop.f32.mrf.mxu2 }
 0x2d8   :  { %v1261_v1 = vpop.f32.mrf.mxu2 }
 0x2db   :  { %v1966_v3 = vpop.permute.xlu0 %1965 }
 0x2dc   :  { %v1968_v0 = vunpack.i.h.bf16 %v1966_v3  ;;  %v1967_v22 = vunpack.i.l.bf16 %v1966_v3 }
 0x2de   :  { %v1101_v45 = vsel %vm446_vm2, %v1029_v59, %v1967_v22  ;;  %v1102_v54 = vsel %vm446_vm2, %v1030_v9, %v1968_v0 }
 0x2df   :  { %v1109_v30 = vpack.c.bf16 %v1102_v54, %v1101_v45 }
 0x2e1   :  { %1239 = vmatmul.bf16.gmra.mxu3 %v1109_v30 }
 0x2ef   :  { %v1971_v18 = vpop.permute.xlu1 %1970 }
 0x2f0   :  { %v1973_v15 = vunpack.i.h.bf16 %v1971_v18  ;;  %v1972_v27 = vunpack.i.l.bf16 %v1971_v18  ;;  %v1264_v52 = vpop.f32.mrf.mxu2 }
 0x2f2   :  { %v1103_v57 = vsel %vm446_vm2, %v1031_v5, %v1972_v27  ;;  %v1104_v20 = vsel %vm446_vm2, %v1032_v41, %v1973_v15 }
 0x2f3   :  { %v1111_v63 = vpack.c.bf16 %v1104_v20, %v1103_v57  ;;  %v1897_v20 = vld [vmem:[%s2677_s5 + $0x78] sm:$0xff] }
 0x2f4   :  { %1584 = vmatpush.bf16.msrb.mxu1 %v1897_v20 }
 0x2f5   :  { %1244 = vmatmul.bf16.gmra.mxu3 %v1111_v63  ;;  %v1896_v63 = vld [vmem:[%s2677_s5 + $0x70] sm:$0xff] }
 0x2f8   :  { %v1266_v28 = vpop.f32.mrf.mxu2  ;;  %1585 = vmatpush.bf16.msrb.mxu1 %v1896_v63 }
 0x2fc   :  { %1586 = vmatpush.bf16.msrb.mxu1 %v1895_v56 }
 0x304   :  { %v1269_v44 = vpop.f32.mrf.mxu2 }
 0x30c   :  { %v1230_v9 = vpop.f32.mrf.mxu3  ;;  %v1271_v35 = vpop.f32.mrf.mxu2 }
 0x30d   :  { %v1260_v59 = vadd.f32 %v1259_v60, %v1230_v9  ;;  %v1888_v60 = vld [vmem:[%s2677_s5 + $0x30] sm:$0xff] }
 0x30e   :  { %1572 = vmatpush.bf16.msra.mxu3 %v1888_v60 }
 0x30f   :  { %v1279_v13 = vmax.f32 %v1260_v59, 0.0  ;;  %v1894_v59 = vld [vmem:[%s2677_s5 + $0x60] sm:$0xff] }
 0x310   :  { %1587 = vmatpush.bf16.msrb.mxu1 %v1894_v59 }
 0x311   :  { %1287 = vst [vmem:[#allocation3] sm:$0xff] %v1279_v13  ;;  %v1887_v13 = vld [vmem:[%s2677_s5 + $0x28] sm:$0xff] }
 0x312   :  { %1573 = vmatpush.bf16.msra.mxu3 %v1887_v13 }
 0x314   :  { %v1232_v17 = vpop.f32.mrf.mxu3  ;;  %v1274_v12 = vpop.f32.mrf.mxu2  ;;  %1588 = vmatpush.bf16.msrb.mxu1 %v1893_v14 }
 0x315   :  { %v1262_v23 = vadd.f32 %v1261_v1, %v1232_v17  ;;  %v1886_v1 = vld [vmem:[%s2677_s5 + $0x20] sm:$0xff]  ;;  %v1892_v17 = vld [vmem:[%s2677_s5 + $0x50] sm:$0xff] }
 0x316   :  { %1574 = vmatpush.bf16.msra.mxu3 %v1886_v1 }
 0x317   :  { %v1280_v58 = vmax.f32 %v1262_v23, 0.0  ;;  %v1891_v23 = vld [vmem:[%s2677_s5 + $0x48] sm:$0xff] }
 0x318   :  { %1589 = vmatpush.bf16.msrb.mxu1 %v1892_v17 }
 0x319   :  { %1288 = vst [vmem:[#allocation3 + $0x8] sm:$0xff] %v1280_v58  ;;  %v1884_v58 = vld [vmem:[%s2677_s5 + $0x10] sm:$0xff] }
 0x31a   :  { %1575 = vmatpush.bf16.msra.mxu3 %v1885_v19 }
 0x31c   :  { %v1276_v4 = vpop.f32.mrf.mxu2  ;;  %1590 = vmatpush.bf16.msrb.mxu1 %v1891_v23 }
 0x31e   :  { %1576 = vmatpush.bf16.msra.mxu3 %v1884_v58 }
 0x320   :  { %v1295_v39 = vld [vmem:[#allocation3] ss:$2 sm:$0xff]  ;;  %v1303_v40 = vld [vmem:[#allocation3 + $0x1] ss:$2 sm:$0xff]  ;;  %1591 = vmatpush.bf16.msrb.mxu1 %v1890_v29 }
 0x321   :  { %v1310_v41 = vmax.f32 %v1295_v39, %v1303_v40 }
 0x32c   :  { %v1235_v21 = vpop.f32.mrf.mxu3 }
 0x32d   :  { %v1265_v48 = vadd.f32 %v1264_v52, %v1235_v21  ;;  %v1883_v52 = vld [vmem:[%s2677_s5 + $0x8] sm:$0xff]  ;;  %v1882_v21 = vld [vmem:[%s2677_s5] sm:$0xff] }
 0x32e   :  { %1577 = vmatpush.bf16.msra.mxu3 %v1883_v52 }
 0x32f   :  { %v1281_v55 = vmax.f32 %v1265_v48, 0.0 }
 0x331   :  { %1289 = vst [vmem:[#allocation3 + $0x10] sm:$0xff] %v1281_v55 }
 0x332   :  { %1578 = vmatpush.bf16.msra.mxu3 %v1882_v21 }
 0x334   :  { %v1237_v31 = vpop.f32.mrf.mxu3 }
 0x335   :  { %v1267_v33 = vadd.f32 %v1266_v28, %v1237_v31 }
 0x337   :  { %v1282_v37 = vmax.f32 %v1267_v33, 0.0 }
 0x339   :  { %1290 = vst [vmem:[#allocation3 + $0x18] sm:$0xff] %v1282_v37 }
 0x340   :  { %v1297_v6 = vld [vmem:[#allocation3 + $0x10] ss:$2 sm:$0xff]  ;;  %v1305_v5 = vld [vmem:[#allocation3 + $0x11] ss:$2 sm:$0xff] }
 0x341   :  { %v1311_v42 = vmax.f32 %v1297_v6, %v1305_v5 }
 0x343   :  { %v1314_v43 = vpack.c.bf16 %v1311_v42, %v1310_v41  ;;  %v1974_v42 = vld [vmem:[%s2678_s6] ss:$0 sm:$0xff] }
 0x345   :  { %1388 = vmatmul.bf16.vlgmr.msrb.gmra.mxu3 %v1314_v43 }
 0x364   :  { %v1240_v38 = vpop.f32.mrf.mxu3 }
 0x365   :  { %v1270_v46 = vadd.f32 %v1269_v44, %v1240_v38 }
 0x367   :  { %v1283_v16 = vmax.f32 %v1270_v46, 0.0 }
 0x369   :  { %1291 = vst [vmem:[#allocation3 + $0x20] sm:$0xff] %v1283_v16 }
 0x36c   :  { %v1242_v47 = vpop.f32.mrf.mxu3 }
 0x36d   :  { %v1272_v34 = vadd.f32 %v1271_v35, %v1242_v47 }
 0x36f   :  { %v1284_v36 = vmax.f32 %v1272_v34, 0.0 }
 0x371   :  { %1292 = vst [vmem:[#allocation3 + $0x28] sm:$0xff] %v1284_v36 }
 0x378   :  { %v1245_v50 = vpop.f32.mrf.mxu3  ;;  %v1299_v49 = vld [vmem:[#allocation3 + $0x20] ss:$2 sm:$0xff]  ;;  %v1307_v61 = vld [vmem:[#allocation3 + $0x21] ss:$2 sm:$0xff] }
 0x379   :  { %v1275_v53 = vadd.f32 %v1274_v12, %v1245_v50  ;;  %v1312_v51 = vmax.f32 %v1299_v49, %v1307_v61 }
 0x37b   :  { %v1285_v7 = vmax.f32 %v1275_v53, 0.0 }
 0x37d   :  { %1293 = vst [vmem:[#allocation3 + $0x30] sm:$0xff] %v1285_v7 }
 0x380   :  { %v1247_v62 = vpop.f32.mrf.mxu3 }
 0x381   :  { %v1277_v32 = vadd.f32 %v1276_v4, %v1247_v62 }
 0x383   :  { %v1286_v2 = vmax.f32 %v1277_v32, 0.0 }
 0x385   :  { %1294 = vst [vmem:[#allocation3 + $0x38] sm:$0xff] %v1286_v2 }
 0x38c   :  { %v1301_v26 = vld [vmem:[#allocation3 + $0x30] ss:$2 sm:$0xff]  ;;  %v1309_v11 = vld [vmem:[#allocation3 + $0x31] ss:$2 sm:$0xff] }
 0x38d   :  { %v1313_v3 = vmax.f32 %v1301_v26, %v1309_v11 }
 0x38f   :  { %v1315_v0 = vpack.c.bf16 %v1313_v3, %v1312_v51 }
 0x391   :  { %1393 = vmatmul.bf16.gmra.mxu3 %v1315_v0 }
 0x3c8   :  { %v1389_v22 = vpop.f32.mrf.mxu3 }
 0x3c9   :  { %1403 = vrot.lane.b32.xlu2 %v1389_v22, %s1975_s9 }
 0x3d0   :  { %v1391_v45 = vpop.f32.mrf.mxu3 }
 0x3d1   :  { %1405 = vrot.lane.b32.xlu0 %v1391_v45, %s1975_s9 }
 0x414   :  { %v1394_v54 = vpop.f32.mrf.mxu3 }
 0x415   :  { %1407 = vrot.lane.b32.xlu1 %v1394_v54, %s1975_s9 }
 0x41c   :  { %v1396_v30 = vpop.f32.mrf.mxu3 }
 0x41d   :  { %1409 = vrot.lane.b32.xlu2 %v1396_v30, %s1975_s9 }
 0x423   :  { %v1404_v18 = vpop.permute.xlu2 %1403 }
 0x424   :  { %v1415_v15 = vmax.f32 %v1389_v22, %v1404_v18 }
 0x426   :  { %1419 = vst.msk [vmem:[#allocation4] sm:$0xff] %vm446_vm2, %v1415_v15 }
 0x443   :  { %v1406_v27 = vpop.permute.xlu0 %1405 }
 0x444   :  { %v1416_v57 = vmax.f32 %v1391_v45, %v1406_v27 }
 0x446   :  { %1420 = vst.msk [vmem:[#allocation4 + $0x8] sm:$0xff] %vm446_vm2, %v1416_v57 }
 0x477   :  { %v1410_v9 = vpop.permute.xlu2 %1409 }
 0x478   :  { %v1418_v10 = vmax.f32 %v1396_v30, %v1410_v9 }
 0x47a   :  { %1422 = vst.msk [vmem:[#allocation4 + $0x18] sm:$0xff] %vm446_vm2, %v1418_v10 }
 0x487   :  { %v1408_v24 = vpop.permute.xlu1 %1407 }
 0x488   :  { %v1417_v25 = vmax.f32 %v1394_v54, %v1408_v24 }
 0x48a   :  { %1421 = vst.msk [vmem:[#allocation4 + $0x10] sm:$0xff] %vm446_vm2, %v1417_v25 }
 0x491   :  { %v1429_v48 = vld [vmem:[#allocation4 + $0x3] ss:$4 sm:$0xff]  ;;  %v1425_v55 = vld [vmem:[#allocation4 + $0x1] ss:$4 sm:$0xff]  ;;  %v1427_v31 = vld [vmem:[#allocation4 + $0x2] ss:$4 sm:$0xff] }
 0x492   :  { %1435 = vrot.lane.b32.xlu1 %v1429_v48, %s1975_s9  ;;  %1431 = vrot.lane.b32.xlu0 %v1425_v55, %s1975_s9  ;;  %v1423_v37 = vld [vmem:[#allocation4] ss:$4 sm:$0xff] }
 0x504   :  { %v1436_v28 = vpop.permute.xlu1 %1435  ;;  %v1432_v33 = vpop.permute.xlu0 %1431 }
 0x505   :  { %v1439_v39 = vsel %vm446_vm2, %v1427_v31, %v1436_v28  ;;  %v1438_v40 = vsel %vm446_vm2, %v1423_v37, %v1432_v33 }
 0x506   :  { %v1441_v6 = vpack.c.bf16 %v1439_v39, %v1439_v39  ;;  %v1440_v5 = vpack.c.bf16 %v1438_v40, %v1438_v40 }
 0x508   :  { %1579 = vmatmul.bf16.vlgmr.msra.gmra.mxu3 %v1440_v5  ;;  %1592 = vmatmul.bf16.vlgmr.msrb.gmra.mxu1 %v1441_v6 }
 0x585   :  { %v1593_v41 = vpop.f32.mrf.mxu1 }
 0x58b   :  { %v1580_v43 = vpop.f32.mrf.mxu3 }
 0x58c   :  { %v1594_v44 = vadd.f32 %v1593_v41, %v1580_v43 }
 0x58d   :  { %v1595_v38 = vpop.f32.mrf.mxu1 }
 0x58e   :  { %v1600_v46 = vadd.f32 %v1974_v42, %v1594_v44 }
 0x590   :  { %1601 = vst [vmem:[%s2679_s7] sm:$0xff] %v1600_v46 }
 0x593   :  { %v1582_v16 = vpop.f32.mrf.mxu3 }

</bundles_post_ra>
